<compile_context>
chip_gen: v5e
topology: v5e:2x2
jax: 0.10.0
libtpu: 0.0.40
codegen_flags: <defaults>
</compile_context>

<pallas_src>
import jax
import jax.numpy as jnp
from jax.experimental import pallas as pl
from jax.experimental.pallas import tpu as pltpu

LANE = 128
_BLOCK_BUDGET = 4 << 20       # ~4 MiB per input block (v5e/v6e sweet spot; v7x-safe)
_MAX_TILE_R = 2048            # row cap (2048 rows * 128 lanes * 4B * C bytes per block)
_CHUNK_ROWS = 256             # max rows live at once inside the kernel


def _largest_div8(n, cap):
    """Largest multiple-of-8 divisor of n (n % 8 == 0) that is <= min(n, cap)."""
    best, d, lim = 8, 8, min(n, cap)
    while d <= lim:
        if n % d == 0:
            best = d
        d += 8
    return best


def _choose_tiling(S, C, B):
    """Pick (padded_row_count R, tile_r) minimizing HBM traffic + step overhead."""
    r_raw = -(-S // LANE)                 # 128-lane rows needed to cover S
    R0 = -(-r_raw // 8) * 8               # minimal sublane-aligned row count
    bytes_per_row = C * LANE * 4          # f32 bytes of the x block per row
    tile_cap = max(8, min(_MAX_TILE_R, (_BLOCK_BUDGET // bytes_per_row) // 8 * 8))

    R, tile_r = R0, _largest_div8(R0, tile_cap)

    # If the divisor-constrained tile gives pathologically small DMA blocks
    # (and a bigger tile is actually possible), allow a little extra row
    # padding to reach a better-factoring row count.  The (rare) extra pad
    # copy is far cheaper than thousands of tiny (~16 KiB) grid steps.
    if tile_r < min(R0, tile_cap) and tile_r * bytes_per_row < (256 << 10):
        best = (R0 // tile_r, R0, tile_r)        # (steps, rows, tile)
        cand = R0 + 8
        while cand <= R0 + tile_cap:
            t = _largest_div8(cand, tile_cap)
            if (cand // t, cand) < best[:2]:
                best = (cand // t, cand, t)
            cand += 8
        _, R, tile_r = best

    # v7x megacore: never collapse to a single grid step if it can be split.
    if B * (R // tile_r) < 2 and tile_r % 16 == 0:
        tile_r //= 2
    return R, tile_r


def _make_kernel(C, tile_r, d_has_bg):
    """Build the kernel for static channel count C and tile_r rows per block.

    d_has_bg: whether the d block still carries the (unused) background
    channel 0 (True on the zero-copy path, False when it was sliced off
    inside the fused pad producer).
    """
    chunk_r = _largest_div8(tile_r, min(tile_r, _CHUNK_ROWS))
    n_chunks = tile_r // chunk_r
    d_base = 1 if d_has_bg else 0

    def kernel(x_ref, d_ref, o_ref):
        # x_ref: (1, C, tile_r, 128); d_ref: (1, C or C-1, tile_r, 128)
        # o_ref: (1, 8, 128) per-block partial sum.

        def chunk_partial(r0):
            rows = pl.ds(r0, chunk_r)
            # Channel max via unrolled elementwise loop (full vregs, no XLU).
            m = x_ref[0, 0, rows, :].astype(jnp.float32)
            for c in range(1, C):
                m = jnp.maximum(m, x_ref[0, c, rows, :].astype(jnp.float32))
            # Folded softmax: num = sum_{c>=1} exp(x_c-m)*d_c ; den = sum_c exp(x_c-m)
            den = jnp.exp(x_ref[0, 0, rows, :].astype(jnp.float32) - m)
            num = jnp.zeros_like(den)
            for c in range(1, C):
                e = jnp.exp(x_ref[0, c, rows, :].astype(jnp.float32) - m)
                den = den + e
                num = num + e * d_ref[0, c - 1 + d_base, rows, :].astype(jnp.float32)
            ratio = num / den          # exact divide (keeps 1e-5 tolerance)
            # (chunk_r,128) -> (8,128) via tile-aligned elementwise adds (VPU only).
            return jnp.sum(ratio.reshape(chunk_r // 8, 8, LANE), axis=0)

        acc = jnp.zeros((8, LANE), jnp.float32)
        if n_chunks <= 16:
            # Static offsets: fully visible to the scheduler, bounded live ranges.
            for ci in range(n_chunks):
                acc = acc + chunk_partial(ci * chunk_r)
        else:
            def body(ci, a):
                r0 = pl.multiple_of(ci * chunk_r, chunk_r)
                return a + chunk_partial(r0)
            acc = jax.lax.fori_loop(0, n_chunks, body, acc)

        o_ref[0, :, :] = acc

    return kernel


def bd_loss(net_output, target, bound):
    """Pallas BDLoss forward. `target` is unused (as in the PyTorch module)."""
    del target  # unused by the reference forward pass
    B, C, W, H = net_output.shape
    if C == 1:
        # No foreground channels: PyTorch's mean of an empty tensor is NaN.
        return jnp.array(jnp.nan, dtype=jnp.float32)

    S = W * H
    R, tile_r = _choose_tiling(S, C, B)
    pad_fires = (R * LANE != S)

    x = net_output.reshape(B, C, S)
    if pad_fires:
        pad = R * LANE - S
        # Zero-padded region: all-zero logits -> finite softmax; bound=0 -> 0 contribution.
        x = jnp.pad(x, ((0, 0), (0, 0), (0, pad)))
        # Slice off the never-read background channel of `bound` inside the
        # same (fused) pad pass, so the kernel never DMAs it.
        d = jnp.pad(bound.reshape(B, C, S)[:, 1:, :], ((0, 0), (0, 0), (0, pad)))
        d_ch = C - 1
        d_has_bg = False
    else:
        # Zero-copy reshapes.  DMA-ing bound channel 0 costs 1/(2C) extra HBM,
        # which is cheaper than a standalone channel-slice copy.
        d = bound.reshape(B, C, S)
        d_ch = C
        d_has_bg = True

    x = x.reshape(B, C, R, LANE)
    d = d.reshape(B, d_ch, R, LANE)
    r_tiles = R // tile_r

    # VMEM budget: 2 buffers per input x block bytes, plus slack for in-kernel
    # chunk temporaries; comfortably under v7x's 64 MiB VMEM.
    xb = C * tile_r * LANE * 4
    db = d_ch * tile_r * LANE * 4
    vmem_limit = int(min(40 << 20, max(16 << 20, 2 * (xb + db) + (4 << 20))))

    kernel = _make_kernel(C, tile_r, d_has_bg)

    partials = pl.pallas_call(
        kernel,
        out_shape=jax.ShapeDtypeStruct((B, r_tiles * 8, LANE), jnp.float32),
        grid=(B, r_tiles),
        in_specs=[
            pl.BlockSpec((1, C, tile_r, LANE), lambda b, r: (b, 0, r, 0)),
            pl.BlockSpec((1, d_ch, tile_r, LANE), lambda b, r: (b, 0, r, 0)),
        ],
        out_specs=pl.BlockSpec((1, 8, LANE), lambda b, r: (b, r, 0)),
        compiler_params=pltpu.CompilerParams(
            dimension_semantics=("parallel", "parallel"),
            vmem_limit_bytes=vmem_limit,
        ),
    )(x, d)

    # Mean over the ORIGINAL (unpadded) foreground element count.
    n_elems = B * (C - 1) * W * H
    return (jnp.sum(partials) / jnp.float32(n_elems)).astype(jnp.float32)


def _bd_loss_ref(net_output, target, bound):
    del target
    sm = jax.nn.softmax(net_output.astype(jnp.float32), axis=1)
    pc = sm[:, 1:, ...]
    dc = bound[:, 1:, ...].astype(jnp.float32)
    return jnp.mean(pc * dc)


if __name__ == "__main__":
    key = jax.random.PRNGKey(0)

    # Case 1: unaligned spatial size (pad path, bound channel 0 sliced off).
    k1, k2, k3, key = jax.random.split(key, 4)
    B, C, W, H = 2, 4, 16, 16
    net_output = jax.random.normal(k1, (B, C, W, H), dtype=jnp.float32)
    target = jax.random.randint(k2, (B, 1, W, H), 0, C).astype(jnp.float32)
    bound = jax.random.normal(k3, (B, C, W, H), dtype=jnp.float32)

    loss = bd_loss(net_output, target, bound)
    jax.block_until_ready(loss)
    ref = _bd_loss_ref(net_output, target, bound)
    assert jnp.allclose(loss, ref, atol=1e-5, rtol=1e-5), (loss, ref)

    # Case 2: 1024-aligned spatial size (zero-copy path, full bound DMA).
    k1, k2, k3, key = jax.random.split(key, 4)
    B2, C2, W2, H2 = 2, 3, 32, 32
    net_output2 = jax.random.normal(k1, (B2, C2, W2, H2), dtype=jnp.float32)
    target2 = jax.random.randint(k2, (B2, 1, W2, H2), 0, C2).astype(jnp.float32)
    bound2 = jax.random.normal(k3, (B2, C2, W2, H2), dtype=jnp.float32)

    loss2 = bd_loss(net_output2, target2, bound2)
    jax.block_until_ready(loss2)
    ref2 = _bd_loss_ref(net_output2, target2, bound2)
    assert jnp.allclose(loss2, ref2, atol=1e-5, rtol=1e-5), (loss2, ref2)

    print("KERNEL_OK")
</pallas_src>

<mosaic_0001>
module attributes {stable_mosaic.version = 11 : i64} {
  func.func @kernel(%arg0: i32, %arg1: i32, %arg2: memref<1x4x8x128xf32, #tpu.memory_space<vmem>>, %arg3: memref<1x3x8x128xf32, #tpu.memory_space<vmem>>, %arg4: memref<1x8x128xf32, #tpu.memory_space<vmem>>) attributes {dimension_semantics = [#tpu.dimension_semantics<parallel>, #tpu.dimension_semantics<parallel>], iteration_bounds = array<i64: 2, 1>, scalar_prefetch = 0 : i64, scratch_operands = 0 : i64, tpu.core_type = #tpu.core_type<tc>, window_params = [{transform_indices = @transform_0, window_bounds = array<i64: 1, 4, 8, 128>}, {transform_indices = @transform_1, window_bounds = array<i64: 1, 3, 8, 128>}, {transform_indices = @transform_2, window_bounds = array<i64: 1, 8, 128>}]} {
    %cst = arith.constant 0.000000e+00 : f32
    %0 = vector.broadcast %cst : f32 to vector<8x128xf32>
    %c0 = arith.constant 0 : index
    %c0_0 = arith.constant 0 : index
    %c0_1 = arith.constant 0 : index
    %c0_2 = arith.constant 0 : index
    %1 = vector.load %arg2[%c0, %c0_0, %c0_1, %c0_2] : memref<1x4x8x128xf32, #tpu.memory_space<vmem>>, vector<1x1x8x128xf32>
    %2 = vector.shape_cast %1 : vector<1x1x8x128xf32> to vector<8x128xf32>
    %c0_3 = arith.constant 0 : index
    %c1 = arith.constant 1 : index
    %c0_4 = arith.constant 0 : index
    %c0_5 = arith.constant 0 : index
    %3 = vector.load %arg2[%c0_3, %c1, %c0_4, %c0_5] : memref<1x4x8x128xf32, #tpu.memory_space<vmem>>, vector<1x1x8x128xf32>
    %4 = vector.shape_cast %3 : vector<1x1x8x128xf32> to vector<8x128xf32>
    %5 = arith.maximumf %2, %4 : vector<8x128xf32>
    %c0_6 = arith.constant 0 : index
    %c2 = arith.constant 2 : index
    %c0_7 = arith.constant 0 : index
    %c0_8 = arith.constant 0 : index
    %6 = vector.load %arg2[%c0_6, %c2, %c0_7, %c0_8] : memref<1x4x8x128xf32, #tpu.memory_space<vmem>>, vector<1x1x8x128xf32>
    %7 = vector.shape_cast %6 : vector<1x1x8x128xf32> to vector<8x128xf32>
    %8 = arith.maximumf %5, %7 : vector<8x128xf32>
    %c0_9 = arith.constant 0 : index
    %c3 = arith.constant 3 : index
    %c0_10 = arith.constant 0 : index
    %c0_11 = arith.constant 0 : index
    %9 = vector.load %arg2[%c0_9, %c3, %c0_10, %c0_11] : memref<1x4x8x128xf32, #tpu.memory_space<vmem>>, vector<1x1x8x128xf32>
    %10 = vector.shape_cast %9 : vector<1x1x8x128xf32> to vector<8x128xf32>
    %11 = arith.maximumf %8, %10 : vector<8x128xf32>
    %c0_12 = arith.constant 0 : index
    %c0_13 = arith.constant 0 : index
    %c0_14 = arith.constant 0 : index
    %c0_15 = arith.constant 0 : index
    %12 = vector.load %arg2[%c0_12, %c0_13, %c0_14, %c0_15] : memref<1x4x8x128xf32, #tpu.memory_space<vmem>>, vector<1x1x8x128xf32>
    %13 = vector.shape_cast %12 : vector<1x1x8x128xf32> to vector<8x128xf32>
    %14 = arith.subf %13, %11 : vector<8x128xf32>
    %15 = math.exp %14 : vector<8x128xf32>
    %cst_16 = arith.constant 0.000000e+00 : f32
    %16 = vector.broadcast %cst_16 : f32 to vector<8x128xf32>
    %c0_17 = arith.constant 0 : index
    %c1_18 = arith.constant 1 : index
    %c0_19 = arith.constant 0 : index
    %c0_20 = arith.constant 0 : index
    %17 = vector.load %arg2[%c0_17, %c1_18, %c0_19, %c0_20] : memref<1x4x8x128xf32, #tpu.memory_space<vmem>>, vector<1x1x8x128xf32>
    %18 = vector.shape_cast %17 : vector<1x1x8x128xf32> to vector<8x128xf32>
    %19 = arith.subf %18, %11 : vector<8x128xf32>
    %20 = math.exp %19 : vector<8x128xf32>
    %21 = arith.addf %15, %20 : vector<8x128xf32>
    %c0_21 = arith.constant 0 : index
    %c0_22 = arith.constant 0 : index
    %c0_23 = arith.constant 0 : index
    %c0_24 = arith.constant 0 : index
    %22 = vector.load %arg3[%c0_21, %c0_22, %c0_23, %c0_24] : memref<1x3x8x128xf32, #tpu.memory_space<vmem>>, vector<1x1x8x128xf32>
    %23 = vector.shape_cast %22 : vector<1x1x8x128xf32> to vector<8x128xf32>
    %24 = arith.mulf %20, %23 : vector<8x128xf32>
    %25 = arith.addf %16, %24 : vector<8x128xf32>
    %c0_25 = arith.constant 0 : index
    %c2_26 = arith.constant 2 : index
    %c0_27 = arith.constant 0 : index
    %c0_28 = arith.constant 0 : index
    %26 = vector.load %arg2[%c0_25, %c2_26, %c0_27, %c0_28] : memref<1x4x8x128xf32, #tpu.memory_space<vmem>>, vector<1x1x8x128xf32>
    %27 = vector.shape_cast %26 : vector<1x1x8x128xf32> to vector<8x128xf32>
    %28 = arith.subf %27, %11 : vector<8x128xf32>
    %29 = math.exp %28 : vector<8x128xf32>
    %30 = arith.addf %21, %29 : vector<8x128xf32>
    %c0_29 = arith.constant 0 : index
    %c1_30 = arith.constant 1 : index
    %c0_31 = arith.constant 0 : index
    %c0_32 = arith.constant 0 : index
    %31 = vector.load %arg3[%c0_29, %c1_30, %c0_31, %c0_32] : memref<1x3x8x128xf32, #tpu.memory_space<vmem>>, vector<1x1x8x128xf32>
    %32 = vector.shape_cast %31 : vector<1x1x8x128xf32> to vector<8x128xf32>
    %33 = arith.mulf %29, %32 : vector<8x128xf32>
    %34 = arith.addf %25, %33 : vector<8x128xf32>
    %c0_33 = arith.constant 0 : index
    %c3_34 = arith.constant 3 : index
    %c0_35 = arith.constant 0 : index
    %c0_36 = arith.constant 0 : index
    %35 = vector.load %arg2[%c0_33, %c3_34, %c0_35, %c0_36] : memref<1x4x8x128xf32, #tpu.memory_space<vmem>>, vector<1x1x8x128xf32>
    %36 = vector.shape_cast %35 : vector<1x1x8x128xf32> to vector<8x128xf32>
    %37 = arith.subf %36, %11 : vector<8x128xf32>
    %38 = math.exp %37 : vector<8x128xf32>
    %39 = arith.addf %30, %38 : vector<8x128xf32>
    %c0_37 = arith.constant 0 : index
    %c2_38 = arith.constant 2 : index
    %c0_39 = arith.constant 0 : index
    %c0_40 = arith.constant 0 : index
    %40 = vector.load %arg3[%c0_37, %c2_38, %c0_39, %c0_40] : memref<1x3x8x128xf32, #tpu.memory_space<vmem>>, vector<1x1x8x128xf32>
    %41 = vector.shape_cast %40 : vector<1x1x8x128xf32> to vector<8x128xf32>
    %42 = arith.mulf %38, %41 : vector<8x128xf32>
    %43 = arith.addf %34, %42 : vector<8x128xf32>
    %44 = arith.divf %43, %39 : vector<8x128xf32>
    %45 = vector.shape_cast %44 : vector<8x128xf32> to vector<1x8x128xf32>
    %cst_41 = arith.constant dense<0.000000e+00> : vector<8x128xf32>
    %46 = vector.multi_reduction <add>, %45, %cst_41 [0] : vector<1x8x128xf32> to vector<8x128xf32>
    %47 = arith.addf %0, %46 : vector<8x128xf32>
    %c0_42 = arith.constant 0 : index
    %c0_43 = arith.constant 0 : index
    %c0_44 = arith.constant 0 : index
    %48 = vector.load %arg4[%c0_42, %c0_43, %c0_44] : memref<1x8x128xf32, #tpu.memory_space<vmem>>, vector<1x8x128xf32>
    %49 = vector.shape_cast %48 : vector<1x8x128xf32> to vector<8x128xf32>
    %50 = vector.shape_cast %47 : vector<8x128xf32> to vector<1x8x128xf32>
    tpu.vector_store %arg4[%c0_42, %c0_43, %c0_44], %50 {strides = array<i32>} : memref<1x8x128xf32, #tpu.memory_space<vmem>>, vector<1x8x128xf32>,
    return
  }
  func.func @transform_0(%arg0: i32, %arg1: i32) -> (i32, i32, i32, i32) {
    %c0_i32 = arith.constant 0 : i32
    %c0_i32_0 = arith.constant 0 : i32
    %c0_i32_1 = arith.constant 0 : i32
    return %arg0, %c0_i32, %arg1, %c0_i32_0 : i32, i32, i32, i32
  }
  func.func @transform_1(%arg0: i32, %arg1: i32) -> (i32, i32, i32, i32) {
    %c0_i32 = arith.constant 0 : i32
    %c0_i32_0 = arith.constant 0 : i32
    %c0_i32_1 = arith.constant 0 : i32
    return %arg0, %c0_i32, %arg1, %c0_i32_0 : i32, i32, i32, i32
  }
  func.func @transform_2(%arg0: i32, %arg1: i32) -> (i32, i32, i32) {
    %c0_i32 = arith.constant 0 : i32
    %c0_i32_0 = arith.constant 0 : i32
    return %arg0, %arg1, %c0_i32 : i32, i32, i32
  }
}

</mosaic_0001>

<bundles_post_ra>
// kernel: tpu_custom_call.1
= control target key start
LH: loop header
LB: loop body
LE: loop exit
PB: predicated region body
PF: predicated region fallthrough
CT: control target
= control target key end

     0   :  { %7 = vsyncpa [#allocation3], 0  ;;  %s821_s0 = inlined_call_operand.hbm [shape: f32[2,4,8,128], index: 0, kind: input, shape index: {}]   ;;  %s822_s1 = inlined_call_operand.hbm [shape: f32[2,3,8,128], index: 1, kind: input, shape index: {}]   ;;  %s823_s2 = inlined_call_operand.hbm [shape: f32[2,8,128], index: 2, kind: output, shape index: {}]  }
   0x1   :  { %9 = vsyncpa [#allocation3 + $0x1], 0 }
   0x2   :  { %10 = vsyncpa [#allocation6], 0 }
   0x3   :  { %12 = vsyncpa [#allocation6 + $0x1], 0 }
   0x4   :  { %13 = vsyncpa [#allocation4], 0 }
   0x5   :  { %15 = vsyncpa [#allocation4 + $0x1], 0  ;;  %s671_s9 = smov 0   ;;  %s673_s10 = smov 0  }
   0x6   :  { %s675_s11 = smov 0   ;;  %s677_s12 = smov 0  }
   0x7   :  { %s679_s13 = smov 0   ;;  %s681_s14 = smov 0  }
   0x8 LB: > { %s403_s15 = sadd.s32 4294967295, %s652_s14   ;;  %s404_s16 = sadd.s32 4294967294, %s652_s14   ;;  %s652_s14 = sphi %s681_s14, %s21_s14   ;;  %s648_s13 = sphi %s679_s13, %s833_s13   ;;  %s644_s12 = sphi %s677_s12, %s832_s12   ;;  %s640_s11 = sphi %s675_s11, %s831_s11   ;;  %s636_s10 = sphi %s673_s10, %s830_s10   ;;  %s632_s9 = sphi %s671_s9, %s829_s9  }
   0x9   : > { %s33_s17 = sadd.s32 1, %s648_s13  ;;  %s42_s18 = sadd.s32 1, %s640_s11 }
   0xa   : > { %p35_p0 = scmp.ge.s32.totalorder %s33_s17, 2  ;;  %p49_p1 = scmp.ne.s32.totalorder %s640_s11, %s636_s10 }
   0xb   : > { %p50_p2 = scmp.eq.s32.totalorder %s652_s14, 0  ;;  %p55_p3 = scmp.ne.s32.totalorder %s636_s10, %s632_s9 }
   0xc   : > { %s835_s17 = smov (%p35_p0, %s33_s17), 0  ;;  %p56_p5 = scmp.eq.s32.totalorder %s403_s15, 0 }
   0xd   : > { %p712_p4 = por %p50_p2, %p49_p1  ;;  %s37_s20 = ssub.s32 %s648_s13, %s835_s17 }
   0xe   : > { %p109_p6 = scmp.eq.s32.totalorder %s403_s15, 1  ;;  %p40_p7 = scmp.eq.s32.totalorder %s37_s20, 0 }
   0xf   : > { %p718_p8 = por %p56_p5, %p55_p3  ;;  %p115_p10 = scmp.eq.s32.totalorder %s404_s16, 1 }
  0x10   : > { %p722_p9 = por %p109_p6, %p49_p1  ;;  %p406_p12 = scmp.ge.s32.totalorder %s652_s14, 2 }
  0x11   : > { %s727_s23 = scalar_select %p40_p7, %s640_s11, %s42_s18  }
  0x12   : > { %p729_p11 = por %p115_p10, %p55_p3  ;;  %p444_p13 = scmp.lt.s32.totalorder %s652_s14, 2 }
  0x13   : > { %s736_s25 = sand.u32 1, %s640_s11   ;;  %s423_s27 = sshll.u32 %s648_s13, 5 }
  0x14   : > { %s407_s26 = sshll.u32 %s736_s25, 5  ;;  %s145_s30 = scalar_lea.hbm %s821_s0, %s423_s27 }
  0x15   : > { %s139_s3 = scalar_lea.vmem [#allocation2], %s407_s26  ;;  %s146_s5 = sshll.u32 %s145_s30, 4  ;;  %s147_s5 = int_to_ptr.hbm [resolvable:$true] %s146_s5 }
  0x16   : > { %s148_s4 = sshll.u32 %s139_s3, 4  ;;  %p745_p0 = pnand %p444_p13, %p712_p4  ;;  %s149_s4 = int_to_ptr.vmem [resolvable:$true] %s148_s4 }
  0x17   : > { %p411_p1 = scmp.ge.s32.totalorder %s652_s14, 1  ;;  %s136_s7 = scalar_lea.sflag [#allocation3], %s736_s25 }
  0x18   : > { %s654_s8 = smov 128   ;;  %s655_s15 = smov 8  }
  0x19   : > { %436 = dma.hbm_to_vmem [thread:$0]  (!%p745_p0), %s147_s5, 512, %s149_s4, %s136_s7, %s654_s8, %s654_s8, %s655_s15  }
  0x1a   : > { %p179_p2 = scmp.lt.s32.totalorder %s652_s14, 3  ;;  %s424_s16 = smul.u32 24, %s736_s25 }
  0x1b   : > { %s425_s18 = smul.u32 24, %s648_s13  ;;  %s159_s30 = scalar_lea.sflag [#allocation6], %s736_s25 }
  0x1c   : > { %p180_p3 = pnand %p411_p1, %p179_p2  ;;  %s162_s27 = scalar_lea.vmem [#allocation5], %s424_s16 }
  0x1d   : > { %s168_s19 = scalar_lea.hbm %s822_s1, %s425_s18  ;;  %s171_s28 = sshll.u32 %s162_s27, 4  ;;  %s172_s28 = int_to_ptr.vmem [resolvable:$true] %s171_s28 }
  0x1e   : > { %s169_s29 = sshll.u32 %s168_s19, 4  ;;  %183 = sbr.rel (%p180_p3) target bundleno = 87 (0x57), region = 28  ;;  %s170_s29 = int_to_ptr.hbm [resolvable:$true] %s169_s29 }
  0x1f   : > { %439 = dma.hbm_to_vmem [thread:$0]  (!%p745_p0), %s170_s29, 384, %s172_s28, %s159_s30, %s654_s8, %s654_s8, %s655_s15  }
  0x20   : > { %s763_s3 = sand.u32 (!%p180_p3), 1, %s636_s10  }
  0x21   : > { %s412_s4 = sshll.u32 (!%p180_p3), %s763_s3, 5  ;;  %s186_s5 = scalar_lea.sflag (!%p180_p3), [#allocation3], %s763_s3 }
  0x22   : > { %s189_s7 = scalar_lea.vmem (!%p180_p3), [#allocation2], %s412_s4 }
  0x23   : > { %619 = dma.done.wait (%p718_p8), %s186_s5, 512  }
  0x24   : > { %621 = vsyncadd (%p718_p8), %s186_s5, 4294966784  ;;  %s426_s25 = smul.u32 24, %s763_s3  ;;  %s196_s6 = scalar_lea.sflag [#allocation6], %s763_s3 }
  0x26   : > { %s773_s8 = scalar_lea.vmem [#allocation5], %s426_s25 }
  0x27   : > { %623 = dma.done.wait (%p718_p8), %s196_s6, 384  }
  0x28   : > { %625 = vsyncadd (%p718_p8), %s196_s6, 4294966912  ;;  %v226_v0 = vld [vmem:[%s189_s7] sm:$0xff]  ;;  %v414_v1 = vld [vmem:[%s189_s7 + $0x8] sm:$0xff]  ;;  %s413_s21 = sshll.u32 %s763_s3, 3  ;;  %s420_s15 = sshll.u32 %s644_s12, 3 }
  0x29   : > { %v415_v2 = vld [vmem:[%s189_s7 + $0x10] sm:$0xff]  ;;  %v229_v3 = vmax.f32 %v226_v0, %v414_v1  ;;  %v416_v4 = vld [vmem:[%s189_s7 + $0x18] sm:$0xff]  ;;  %v417_v23 = vld [vmem:[%s773_s8 + $0x8] sm:$0xff]  ;;  %s292_s20 = scalar_lea.hbm %s823_s2, %s420_s15  ;;  %s225_s26 = scalar_lea.vmem [#allocation7], %s413_s21 }
  0x2a   : > { %v243_v22 = vld [vmem:[%s773_s8] sm:$0xff]  ;;  %v418_v26 = vld [vmem:[%s773_s8 + $0x10] sm:$0xff]  ;;  %s294_s19 = sshll.u32 %s225_s26, 4  ;;  %s296_s27 = sshll.u32 %s292_s20, 4  ;;  %s295_s19 = int_to_ptr.vmem [resolvable:$true] %s294_s19  ;;  %s297_s27 = int_to_ptr.hbm [resolvable:$true] %s296_s27 }
  0x2b   : > { %v232_v5 = vmax.f32 %v229_v3, %v415_v2  ;;  %s281_s12 = scalar_lea.sflag [#allocation4], %s763_s3  ;;  %s580_s28 = sshra.s32 %s297_s27, 4  ;;  %s581_s28 = int_to_ptr.hbm [resolvable:$true] %s580_s28 }
  0x2c   : > { %s582_s29 = scalar_lea.hbm %s581_s28, 8  ;;  %s586_s5 = scalar_lea.hbm %s823_s2, 16 }
  0x2d   : > { %v235_v6 = vmax.f32 %v232_v5, %v416_v4  ;;  %p583_p4 = scmp.ne.s32.totalorder %s581_s28, %s582_s29  ;;  %p587_p7 = scmp.lt.s32.totalorder %s581_s28, %s823_s2 }
  0x2e   : > { %p588_p8 = scmp.lt.s32.totalorder %s586_s5, %s582_s29 }
  0x2f   : > { %v236_v7 = vsub.f32 %v226_v0, %v235_v6  ;;  %v239_v8 = vsub.f32 %v414_v1, %v235_v6  ;;  %v246_v9 = vsub.f32 %v415_v2, %v235_v6  ;;  %v254_v10 = vsub.f32 %v416_v4, %v235_v6  ;;  %p584_p5 = pnand %p583_p4, %p722_p9 }
  0x30   : > { %p589_p10 = por %p588_p8, %p587_p7 }
  0x31   : > { %v237_v11 = vmul.f32 1.442695, %v236_v7  ;;  %v240_v12 = vmul.f32 1.442695, %v239_v8  ;;  %v247_v13 = vmul.f32 1.442695, %v246_v9  ;;  %p585_p6 = pneg %p584_p5 }
  0x32   : > { %v255_v14 = vmul.f32 1.442695, %v254_v10 }
  0x33   : > { %496 = vpow2.f32 %v237_v11  ;;  %p590_p13 = pnand %p589_p10, %p585_p6 }
  0x34   : > { %498 = vpow2.f32 %v240_v12 }
  0x35   : > { %500 = vpow2.f32 %v247_v13 }
  0x36   : > { %502 = vpow2.f32 %v255_v14 }
  0x39   : > { %v497_v15 = vpop.eup %496 }
  0x3a   : > { %v499_v16 = vpop.eup %498 }
  0x3b   : > { %v501_v17 = vpop.eup %500  ;;  %v242_v18 = vadd.f32 %v499_v16, %v497_v15  ;;  %v244_v24 = vmul.f32 %v499_v16, %v243_v22 }
  0x3c   : > { %v503_v19 = vpop.eup %502  ;;  %v252_v25 = vmul.f32 %v501_v17, %v417_v23 }
  0x3d   : > { %v249_v20 = vadd.f32 %v501_v17, %v242_v18  ;;  %v260_v30 = vmul.f32 %v503_v19, %v418_v26 }
  0x3e   : > { %v253_v29 = vadd.f32 %v252_v25, %v244_v24 }
  0x3f   : > { %v257_v21 = vadd.f32 %v503_v19, %v249_v20 }
  0x40   : > { %v261_v36 = vadd.f32 %v260_v30, %v253_v29 }
  0x41   : > { %504 = vrcp.f32 %v257_v21  ;;  %v273_v31 = vand.u32 2147483648, %v257_v21  ;;  %vm267_vm0 = vweird.f32 %v257_v21  ;;  %v271_v33 = vand.u32 2147483647, %v257_v21 }
  0x43   : > { %v274_v35 = vor.u32 1.1754944e-38, %v273_v31  ;;  %vm272_vm3 = vcmp.eq.f32.partialorder %v271_v33, 8.507059e+37 }
  0x47   : > { %v505_v27 = vpop.eup %504 }
  0x48   : > { %v263_v28 = vmul.f32 %v505_v27, %v257_v21  ;;  %vm268_vm1 = vweird.f32 %v505_v27 }
  0x49   : > { %vm269_vm2 = vmor %vm267_vm0, %vm268_vm1 }
  0x4a   : > { %v264_v32 = vsub.f32 1.0, %v263_v28 }
  0x4c   : > { %v265_v34 = vmul.f32 %v505_v27, %v264_v32 }
  0x4e   : > { %v266_v37 = vadd.f32 %v505_v27, %v265_v34 }
  0x50   : > { %v270_v38 = vsel %vm269_vm2, %v505_v27, %v266_v37 }
  0x51   : > { %v275_v39 = vsel %vm272_vm3, %v274_v35, %v270_v38 }
  0x52   : > { %v276_v40 = vmul.f32 %v275_v39, %v261_v36 }
  0x54   : > { %279 = vst [vmem:[%s225_s26] sm:$0xff] %v276_v40 }
  0x55   : > { %593 = shalt.err (!%p590_p13)
}
  0x56   : > { %431 = dma.vmem_to_hbm [thread:$0]  (%p722_p9), %s295_s19, 128, %s297_s27, %s281_s12  }
  0x57 PF: > { %s308_s3 = sand.u32 1, %s632_s9   ;;  %p441_p0 = pnand %p406_p12, %p729_p11 }
  0x58   : > { %s309_s6 = scalar_lea.sflag [#allocation4], %s308_s3 }
  0x59   : > { %p442_p1 = pneg %p441_p0 }
  0x5b   : > { %627 = dma.done.wait (%p442_p1), %s309_s6, 128  }
  0x5c   : > { %629 = vsyncadd (%p442_p1), %s309_s6, 4294967168  ;;  %s21_s14 = sadd.s32 1, %s652_s14   ;;  %s829_s9 = smov %s636_s10 }
  0x5d   : > { %p18_p2 = scmp.ge.s32.totalorder %s21_s14, 4   ;;  %s830_s10 = smov %s640_s11 }
  0x5e   : > { %s831_s11 = smov %s727_s23  ;;  %s832_s12 = smov %s648_s13 }
  0x5f   : > { %s833_s13 = smov %s835_s17  ;;  %20 = sbr.rel (!%p18_p2) target bundleno = 8 (0x8), region = 91 }
  0x64   :  { %315 = vsyncpa [#allocation3], 1 }
  0x65   :  { %317 = vsyncpa [#allocation3 + $0x1], 1 }
  0x66   :  { %318 = vsyncpa [#allocation6], 1 }
  0x67   :  { %320 = vsyncpa [#allocation6 + $0x1], 1 }
  0x68   :  { %321 = vsyncpa [#allocation4], 1 }
  0x69   :  { %323 = vsyncpa [#allocation4 + $0x1], 1 }

</bundles_post_ra>
